<compile_context>
chip_gen: v5e
topology: v5e:2x2
jax: 0.10.0
libtpu: 0.0.40
codegen_flags: <defaults>
</compile_context>

<pallas_src>
import jax
import jax.numpy as jnp
from jax.experimental import pallas as pl
from jax.experimental.pallas import tpu as pltpu


def _tlu_kernel(x_ref, o_ref, *, threshold):
    x = x_ref[...]
    t = jnp.asarray(threshold, dtype=x.dtype)
    o_ref[...] = jnp.clip(x, -t, t)


def tlu(x, threshold, *, target_block_bytes=4 << 20, vmem_limit_bytes=32 << 20):
    """Elementwise symmetric clamp: clamp(x, -threshold, +threshold).

    x: any-rank array (e.g. NCHW). Returns array of same shape/dtype.
    """
    orig_shape = x.shape
    orig_dtype = x.dtype
    n = x.size
    if n == 0:
        return x

    itemsize = jnp.dtype(orig_dtype).itemsize

    # Pick a lane width: largest multiple of 128 (from candidates) dividing n,
    # so the fully-flattened view reshapes with zero padding.
    lane_candidates = (4096, 2048, 1024, 512, 256, 128)
    lane_w = None
    for c in lane_candidates:
        if n % c == 0:
            lane_w = c
            break

    flat = x.reshape(-1)
    pad = 0
    if lane_w is None:
        # Rare fallback: pad only a tail of < one row (<= 1023 elements).
        lane_w = 1024
        pad = (-n) % lane_w
        flat = jnp.pad(flat, ((0, pad),))

    rows = (n + pad) // lane_w

    # Rows per block: ~target_block_bytes per block, multiple of 8 sublanes.
    rows_target = max(8, target_block_bytes // (lane_w * itemsize))
    if rows <= rows_target:
        block_rows = rows          # full sublane extent (single row-block)
    else:
        block_rows = max(8, (rows_target // 8) * 8)

    x2 = flat.reshape(rows, lane_w)
    grid = (pl.cdiv(rows, block_rows),)

    out = pl.pallas_call(
        lambda x_ref, o_ref: _tlu_kernel(x_ref, o_ref, threshold=threshold),
        out_shape=jax.ShapeDtypeStruct((rows, lane_w), orig_dtype),
        grid_spec=pltpu.PrefetchScalarGridSpec(
            num_scalar_prefetch=0,
            grid=grid,
            in_specs=[pl.BlockSpec((block_rows, lane_w), lambda i: (i, 0))],
            out_specs=pl.BlockSpec((block_rows, lane_w), lambda i: (i, 0)),
        ),
        compiler_params=pltpu.CompilerParams(
            dimension_semantics=("parallel",),
            vmem_limit_bytes=vmem_limit_bytes,
        ),
    )(x2)

    out_flat = out.reshape(-1)
    if pad:
        out_flat = out_flat[:n]
    return out_flat.reshape(orig_shape)


if __name__ == "__main__":
    threshold = 0.5
    key = jax.random.PRNGKey(0)
    # NCHW input, small shapes: batch=2, channels=4, spatial=16x16
    x = jax.random.normal(key, (2, 4, 16, 16), dtype=jnp.float32)

    y = tlu(x, threshold)
    y = jax.block_until_ready(y)

    # Reference check against plain JAX clamp.
    y_ref = jnp.clip(x, -threshold, threshold)
    assert y.shape == x.shape and y.dtype == x.dtype
    assert jnp.allclose(y, y_ref), "mismatch vs reference clamp"

    print("KERNEL_OK")
</pallas_src>

<mosaic_0001>
module attributes {stable_mosaic.version = 11 : i64} {
  func.func @_lambda_(%arg0: i32, %arg1: memref<1x2048xf32, #tpu.memory_space<vmem>>, %arg2: memref<1x2048xf32, #tpu.memory_space<vmem>>) attributes {dimension_semantics = [#tpu.dimension_semantics<parallel>], iteration_bounds = array<i64: 1>, scalar_prefetch = 0 : i64, scratch_operands = 0 : i64, tpu.core_type = #tpu.core_type<tc>, window_params = [{transform_indices = @transform_0, window_bounds = array<i64: 1, 2048>}, {transform_indices = @transform_1, window_bounds = array<i64: 1, 2048>}]} {
    %c0 = arith.constant 0 : index
    %c0_0 = arith.constant 0 : index
    %0 = vector.load %arg1[%c0, %c0_0] : memref<1x2048xf32, #tpu.memory_space<vmem>>, vector<1x2048xf32>
    %cst = arith.constant 0.000000e+00 : f32
    %cst_1 = arith.constant 5.000000e-01 : f32
    %1 = arith.subf %cst, %cst_1 : f32
    %cst_2 = arith.constant 5.000000e-01 : f32
    %2 = vector.broadcast %1 : f32 to vector<1x2048xf32>
    %3 = arith.maximumf %2, %0 : vector<1x2048xf32>
    %4 = vector.broadcast %cst_2 : f32 to vector<1x2048xf32>
    %5 = arith.minimumf %4, %3 : vector<1x2048xf32>
    %c0_3 = arith.constant 0 : index
    %c0_4 = arith.constant 0 : index
    %6 = vector.load %arg2[%c0_3, %c0_4] : memref<1x2048xf32, #tpu.memory_space<vmem>>, vector<1x2048xf32>
    tpu.vector_store %arg2[%c0_3, %c0_4], %5 {strides = array<i32>} : memref<1x2048xf32, #tpu.memory_space<vmem>>, vector<1x2048xf32>,
    return
  }
  func.func @transform_0(%arg0: i32) -> (i32, i32) {
    %c0_i32 = arith.constant 0 : i32
    %c0_i32_0 = arith.constant 0 : i32
    return %arg0, %c0_i32 : i32, i32
  }
  func.func @transform_1(%arg0: i32) -> (i32, i32) {
    %c0_i32 = arith.constant 0 : i32
    %c0_i32_0 = arith.constant 0 : i32
    return %arg0, %c0_i32 : i32, i32
  }
}

</mosaic_0001>

<bundles_post_ra>
// kernel: tpu_custom_call.1
= control target key start
LH: loop header
LB: loop body
LE: loop exit
PB: predicated region body
PF: predicated region fallthrough
CT: control target
= control target key end

     0   :  { %6 = vsyncpa [#allocation3], 0  ;;  %s122_s0 = inlined_call_operand.hbm [shape: f32[1,2048], index: 0, kind: input, shape index: {}]   ;;  %s123_s1 = inlined_call_operand.hbm [shape: f32[1,2048], index: 1, kind: output, shape index: {}]  }
   0x1   :  { %7 = vsyncpa [#allocation4], 0  ;;  %s13_s8 = sshll.u32 %s122_s0, 4  ;;  %s104_s9 = smov [#allocation2]   ;;  %s14_s8 = int_to_ptr.hbm [resolvable:$true] %s13_s8 }
   0x2   :  { %s15_s10 = sshll.u32 %s104_s9, 4  ;;  %s16_s10 = int_to_ptr.vmem [resolvable:$true] %s15_s10 }
   0x3   :  { %18 = dma.hbm_to_vmem [thread:$0]  %s14_s8, 256, %s16_s10, [#allocation3]  }
   0x4   :  { %100 = dma.done.wait [#allocation3], 256  }
   0x5   :  { %101 = vsyncadd [#allocation3], 4294967040  ;;  %s105_s11 = smov [#allocation5]   ;;  %s38_s15 = sshll.u32 %s123_s1, 4  ;;  %v23_v0 = vld [vmem:[#allocation2] sm:$0xff]  ;;  %v24_v1 = vld [vmem:[#allocation2 + $0x8] sm:$0xff]  ;;  %s39_s15 = int_to_ptr.hbm [resolvable:$true] %s38_s15 }
   0x6   :  { %s36_s12 = sshll.u32 %s105_s11, 4  ;;  %v48_v2 = vclamps-f32 %v23_v0, 0.5  ;;  %v49_v3 = vclamps-f32 %v24_v1, 0.5  ;;  %s37_s12 = int_to_ptr.vmem [resolvable:$true] %s36_s12 }
   0x8   :  { %29 = vst [vmem:[#allocation5] sm:$0xff] %v48_v2 }
   0x9   :  { %30 = vst [vmem:[#allocation5 + $0x8] sm:$0xff] %v49_v3 }
   0xa   :  { %41 = dma.vmem_to_hbm [thread:$0]  %s37_s12, 256, %s39_s15, [#allocation4]  }
   0xb   :  { %102 = dma.done.wait [#allocation4], 256  }
   0xc   :  { %103 = vsyncadd [#allocation4], 4294967040 }
   0xd   :  { %46 = vsyncpa [#allocation3], 1 }
   0xe   :  { %47 = vsyncpa [#allocation4], 1 }

</bundles_post_ra>
